<compile_context>
chip_gen: v6e
topology: v6e:2x2x1
jax: 0.10.0
libtpu: 0.0.40
codegen_flags: <defaults>
</compile_context>

<pallas_src>
import jax
import jax.numpy as jnp
from jax.experimental import pallas as pl
from jax.experimental.pallas import tpu as pltpu


def _round_up(x, m):
    return ((x + m - 1) // m) * m


def _pick_tile(P, Cinp, Coutp, x_bytes, out_bytes, tile_cap, vmem_budget):
    """Largest 8-aligned spatial tile that fits the VMEM budget while
    minimizing padded rows + per-grid-step overhead."""
    P8 = _round_up(max(P, 8), 8)
    # x quadrants + output are double-buffered by the pipeline; weight is
    # (requested) single-buffered.
    per_row = 2 * (4 * Cinp * x_bytes) + 2 * (Coutp * out_bytes)
    fixed = Cinp * Coutp * x_bytes + 8 * Coutp * 4
    max_t = max(8, (vmem_budget - fixed) // per_row)
    cap = max(8, min(tile_cap, max_t, P8))
    cap = (cap // 8) * 8
    best_t, best_cost = 8, None
    for t in range(8, cap + 1, 8):
        steps = -(-P8 // t)
        cost = steps * t + 16 * steps          # total DMA'd rows + step overhead
        if best_cost is None or cost < best_cost or (cost == best_cost and t >= best_t):
            best_t, best_cost = t, cost
    return best_t


# ----------------------------------------------------------------------------
# Pallas kernels
# ----------------------------------------------------------------------------
def _transition_kernel_even(x_ref, w_ref, bias_ref, o_ref):
    # x_ref:  (4, 1, T, Cinp) bf16 quadrants   w_ref: (Cinp, Coutp) bf16
    # bias_ref: (1, Coutp) f32                 o_ref: (1, T, Coutp)
    # BN scale and the 1/4 pool divisor are already folded into w / bias.
    w = w_ref[...]
    bias = bias_ref[...]

    def quad(q):
        y = jnp.dot(x_ref[q, 0], w, preferred_element_type=jnp.float32)
        return jnp.maximum(y + bias, 0.0)

    out = quad(0) + quad(1) + quad(2) + quad(3)
    o_ref[0] = out.astype(o_ref.dtype)


def _transition_kernel_odd(x_ref, w_ref, bias_ref, rb_ref, inv_ref, corr_ref,
                           o_ref):
    # Ceil-mode edge windows: a zero-padded pixel contributes exactly
    # relu(bias), so  out = ysum * inv - (n_invalid * inv) * relu(bias).
    # inv_ref / corr_ref: (T, 1) f32;  rb_ref: (1, Coutp) f32 = relu(bias).
    w = w_ref[...]
    bias = bias_ref[...]

    def quad(q):
        y = jnp.dot(x_ref[q, 0], w, preferred_element_type=jnp.float32)
        return jnp.maximum(y + bias, 0.0)

    ysum = quad(0) + quad(1) + quad(2) + quad(3)
    out = ysum * inv_ref[...] - corr_ref[...] * rb_ref[...]
    o_ref[0] = out.astype(o_ref.dtype)


# ----------------------------------------------------------------------------
# Wrapper: NCHW in -> NCHW out (to match the PyTorch module interface)
# ----------------------------------------------------------------------------
def transition_forward(x_nchw, conv_w, gamma, beta, run_mean, run_var,
                       eps=1e-5, tile_p=512, compute_dtype=jnp.bfloat16,
                       vmem_limit_bytes=64 * 1024 * 1024,
                       vmem_tile_budget=36 * 1024 * 1024):
    N, Cin, H, W = x_nchw.shape
    Cout = conv_w.shape[0]
    Ho, Wo = -(-H // 2), -(-W // 2)
    Hp, Wp = 2 * Ho, 2 * Wo
    P = Ho * Wo
    even = (H % 2 == 0) and (W % 2 == 0)

    f32 = jnp.float32
    out_dtype = x_nchw.dtype
    cdt = jnp.dtype(compute_dtype)

    Cinp = _round_up(Cin, 128)
    Coutp = _round_up(Cout, 128)
    T = _pick_tile(P, Cinp, Coutp, cdt.itemsize, jnp.dtype(out_dtype).itemsize,
                   tile_p, vmem_tile_budget)
    Pp = _round_up(P, T)
    n_pt = Pp // T

    # --- Activations: cast to the (bf16) compute dtype FIRST so the single
    # relayout pass moves half the bytes; then zero-pad H/W to even, go
    # channels-last and split into the four 2x2-window quadrants.
    x = x_nchw.astype(cdt)
    x = jnp.pad(x, ((0, 0), (0, 0), (0, Hp - H), (0, Wp - W)))
    x = x.reshape(N, Cin, Ho, 2, Wo, 2)
    x = jnp.transpose(x, (3, 5, 0, 2, 4, 1))      # (2, 2, N, Ho, Wo, Cin)
    x = x.reshape(4, N, P, Cin)
    x = jnp.pad(x, ((0, 0), (0, 0), (0, Pp - P), (0, Cinp - Cin)))

    # --- Fold BatchNorm (inference) into the 1x1 conv weight + per-channel bias.
    inv_std = jax.lax.rsqrt(run_var.astype(f32) + eps)
    scale = gamma.astype(f32) * inv_std
    bias = beta.astype(f32) - run_mean.astype(f32) * scale

    w = conv_w[:, :, 0, 0].astype(f32).T * scale[None, :]        # (Cin, Cout)
    if even:
        # relu(0.25*z) == 0.25*relu(z): fold the pool divisor in as well.
        w = w * 0.25
        bias = bias * 0.25
    w = jnp.pad(w, ((0, Cinp - Cin), (0, Coutp - Cout))).astype(cdt)
    bias_p = jnp.pad(bias, (0, Coutp - Cout)).reshape(1, Coutp)

    if not even:
        relu_bias = jnp.maximum(bias, 0.0)
        rb_p = jnp.pad(relu_bias, (0, Coutp - Cout)).reshape(1, Coutp)
        cnt_h = jnp.minimum(2, H - 2 * jnp.arange(Ho)).astype(f32)   # (Ho,)
        cnt_w = jnp.minimum(2, W - 2 * jnp.arange(Wo)).astype(f32)   # (Wo,)
        cnt = (cnt_h[:, None] * cnt_w[None, :]).reshape(P, 1)
        inv_cnt = 1.0 / cnt
        corr = (4.0 - cnt) * inv_cnt
        inv_cnt = jnp.pad(inv_cnt, ((0, Pp - P), (0, 0)), constant_values=1.0)
        corr = jnp.pad(corr, ((0, Pp - P), (0, 0)))

    def build(use_buffered):
        bkw = dict(pipeline_mode=pl.Buffered(1)) if use_buffered else {}
        x_spec = pl.BlockSpec((4, 1, T, Cinp), lambda b, t: (0, b, t, 0))
        w_spec = pl.BlockSpec((Cinp, Coutp), lambda b, t: (0, 0), **bkw)
        vec_spec = pl.BlockSpec((1, Coutp), lambda b, t: (0, 0), **bkw)
        row_spec = pl.BlockSpec((T, 1), lambda b, t: (t, 0))
        out_spec = pl.BlockSpec((1, T, Coutp), lambda b, t: (b, t, 0))

        if even:
            kernel = _transition_kernel_even
            in_specs = [x_spec, w_spec, vec_spec]
            args = (x, w, bias_p)
        else:
            kernel = _transition_kernel_odd
            in_specs = [x_spec, w_spec, vec_spec, vec_spec, row_spec, row_spec]
            args = (x, w, bias_p, rb_p, inv_cnt, corr)

        call = pl.pallas_call(
            kernel,
            out_shape=jax.ShapeDtypeStruct((N, Pp, Coutp), out_dtype),
            grid_spec=pltpu.PrefetchScalarGridSpec(
                num_scalar_prefetch=0,
                grid=(N, n_pt),
                in_specs=in_specs,
                out_specs=out_spec,
            ),
            compiler_params=pltpu.CompilerParams(
                dimension_semantics=("parallel", "parallel"),
                vmem_limit_bytes=vmem_limit_bytes,
            ),
        )
        return call(*args)

    try:
        out = build(True)
    except Exception:
        # Fallback: this jax version rejects Buffered(1); default buffering.
        out = build(False)

    # Strip padding and return NCHW to match the PyTorch interface.
    out = out[:, :P, :Cout].reshape(N, Ho, Wo, Cout)
    return jnp.transpose(out, (0, 3, 1, 2))


# ----------------------------------------------------------------------------
# Pure-JAX reference (mirrors the PyTorch forward in eval mode)
# ----------------------------------------------------------------------------
def transition_reference(x_nchw, conv_w, gamma, beta, run_mean, run_var, eps=1e-5):
    y = jnp.einsum("nchw,oc->nohw", x_nchw, conv_w[:, :, 0, 0])
    y = (y - run_mean[None, :, None, None]) / jnp.sqrt(
        run_var[None, :, None, None] + eps)
    y = y * gamma[None, :, None, None] + beta[None, :, None, None]
    y = jnp.maximum(y, 0.0)
    N, C, H, W = y.shape
    Ho, Wo = -(-H // 2), -(-W // 2)
    yp = jnp.pad(y, ((0, 0), (0, 0), (0, 2 * Ho - H), (0, 2 * Wo - W)))
    s = yp.reshape(N, C, Ho, 2, Wo, 2).sum(axis=(3, 5))
    cnt_h = jnp.minimum(2, H - 2 * jnp.arange(Ho))
    cnt_w = jnp.minimum(2, W - 2 * jnp.arange(Wo))
    div = (cnt_h[:, None] * cnt_w[None, :]).astype(y.dtype)
    return s / div[None, None, :, :]


if __name__ == "__main__":
    key = jax.random.PRNGKey(0)
    k_x1, k_x2, k_w, k_g, k_b, k_m, k_v = jax.random.split(key, 7)

    N, Cin, Cout = 2, 4, 8
    conv_w = jax.random.normal(k_w, (Cout, Cin, 1, 1), dtype=jnp.float32) * 0.2
    gamma = 1.0 + 0.1 * jax.random.normal(k_g, (Cout,), dtype=jnp.float32)
    beta = 0.1 * jax.random.normal(k_b, (Cout,), dtype=jnp.float32)
    run_mean = 0.1 * jax.random.normal(k_m, (Cout,), dtype=jnp.float32)
    run_var = jnp.abs(1.0 + 0.1 * jax.random.normal(k_v, (Cout,), dtype=jnp.float32))

    # Even H/W exercises the fast path; odd H/W exercises ceil-mode fixup.
    for (H, W), kx in (((16, 16), k_x1), ((15, 13), k_x2)):
        x = jax.random.normal(kx, (N, Cin, H, W), dtype=jnp.float32)
        out = jax.block_until_ready(
            transition_forward(x, conv_w, gamma, beta, run_mean, run_var))
        ref = transition_reference(x, conv_w, gamma, beta, run_mean, run_var)
        assert out.shape == (N, Cout, -(-H // 2), -(-W // 2)), out.shape
        # bf16 operands (f32 accumulation) vs an all-f32 reference.
        err = float(jnp.max(jnp.abs(out.astype(jnp.float32) - ref)))
        assert err < 2e-2, err

    print("KERNEL_OK")
</pallas_src>

<mosaic_0001>
module attributes {stable_mosaic.version = 11 : i64} {
  func.func @_transition_kernel_even(%arg0: i32, %arg1: i32, %arg2: memref<4x1x64x128xbf16, #tpu.memory_space<vmem>>, %arg3: memref<128x128xbf16, #tpu.memory_space<vmem>>, %arg4: memref<1x128xf32, #tpu.memory_space<vmem>>, %arg5: memref<1x64x128xf32, #tpu.memory_space<vmem>>) attributes {dimension_semantics = [#tpu.dimension_semantics<parallel>, #tpu.dimension_semantics<parallel>], iteration_bounds = array<i64: 2, 1>, scalar_prefetch = 0 : i64, scratch_operands = 0 : i64, tpu.core_type = #tpu.core_type<tc>, window_params = [{transform_indices = @transform_0, window_bounds = array<i64: 4, 1, 64, 128>}, {pipeline_mode = #tpu.pipeline_mode<synchronous>, transform_indices = @transform_1, window_bounds = array<i64: 128, 128>}, {pipeline_mode = #tpu.pipeline_mode<synchronous>, transform_indices = @transform_2, window_bounds = array<i64: 1, 128>}, {transform_indices = @transform_3, window_bounds = array<i64: 1, 64, 128>}]} {
    %c0 = arith.constant 0 : index
    %c0_0 = arith.constant 0 : index
    %0 = vector.load %arg3[%c0, %c0_0] : memref<128x128xbf16, #tpu.memory_space<vmem>>, vector<128x128xbf16>
    %c0_1 = arith.constant 0 : index
    %c0_2 = arith.constant 0 : index
    %1 = vector.load %arg4[%c0_1, %c0_2] : memref<1x128xf32, #tpu.memory_space<vmem>>, vector<1x128xf32>
    %c0_3 = arith.constant 0 : index
    %c0_4 = arith.constant 0 : index
    %c0_5 = arith.constant 0 : index
    %c0_6 = arith.constant 0 : index
    %2 = vector.load %arg2[%c0_3, %c0_4, %c0_5, %c0_6] : memref<4x1x64x128xbf16, #tpu.memory_space<vmem>>, vector<1x1x64x128xbf16>
    %3 = vector.shape_cast %2 : vector<1x1x64x128xbf16> to vector<64x128xbf16>
    %cst = arith.constant dense<0.000000e+00> : vector<64x128xf32>
    %4 = tpu.matmul %3, %0, %cst {dimension_numbers = #tpu.dot_dimension_numbers<[1], [0], [0], [1], [0, 0, 1, 1], [], []>} : vector<64x128xbf16>, vector<128x128xbf16>, vector<64x128xf32> -> vector<64x128xf32>
    %5 = vector.broadcast %1 : vector<1x128xf32> to vector<64x128xf32>
    %6 = arith.addf %4, %5 : vector<64x128xf32>
    %cst_7 = arith.constant 0.000000e+00 : f32
    %7 = vector.broadcast %cst_7 : f32 to vector<64x128xf32>
    %8 = arith.maximumf %6, %7 : vector<64x128xf32>
    %c1 = arith.constant 1 : index
    %c0_8 = arith.constant 0 : index
    %c0_9 = arith.constant 0 : index
    %c0_10 = arith.constant 0 : index
    %9 = vector.load %arg2[%c1, %c0_8, %c0_9, %c0_10] : memref<4x1x64x128xbf16, #tpu.memory_space<vmem>>, vector<1x1x64x128xbf16>
    %10 = vector.shape_cast %9 : vector<1x1x64x128xbf16> to vector<64x128xbf16>
    %cst_11 = arith.constant dense<0.000000e+00> : vector<64x128xf32>
    %11 = tpu.matmul %10, %0, %cst_11 {dimension_numbers = #tpu.dot_dimension_numbers<[1], [0], [0], [1], [0, 0, 1, 1], [], []>} : vector<64x128xbf16>, vector<128x128xbf16>, vector<64x128xf32> -> vector<64x128xf32>
    %12 = vector.broadcast %1 : vector<1x128xf32> to vector<64x128xf32>
    %13 = arith.addf %11, %12 : vector<64x128xf32>
    %cst_12 = arith.constant 0.000000e+00 : f32
    %14 = vector.broadcast %cst_12 : f32 to vector<64x128xf32>
    %15 = arith.maximumf %13, %14 : vector<64x128xf32>
    %16 = arith.addf %8, %15 : vector<64x128xf32>
    %c2 = arith.constant 2 : index
    %c0_13 = arith.constant 0 : index
    %c0_14 = arith.constant 0 : index
    %c0_15 = arith.constant 0 : index
    %17 = vector.load %arg2[%c2, %c0_13, %c0_14, %c0_15] : memref<4x1x64x128xbf16, #tpu.memory_space<vmem>>, vector<1x1x64x128xbf16>
    %18 = vector.shape_cast %17 : vector<1x1x64x128xbf16> to vector<64x128xbf16>
    %cst_16 = arith.constant dense<0.000000e+00> : vector<64x128xf32>
    %19 = tpu.matmul %18, %0, %cst_16 {dimension_numbers = #tpu.dot_dimension_numbers<[1], [0], [0], [1], [0, 0, 1, 1], [], []>} : vector<64x128xbf16>, vector<128x128xbf16>, vector<64x128xf32> -> vector<64x128xf32>
    %20 = vector.broadcast %1 : vector<1x128xf32> to vector<64x128xf32>
    %21 = arith.addf %19, %20 : vector<64x128xf32>
    %cst_17 = arith.constant 0.000000e+00 : f32
    %22 = vector.broadcast %cst_17 : f32 to vector<64x128xf32>
    %23 = arith.maximumf %21, %22 : vector<64x128xf32>
    %24 = arith.addf %16, %23 : vector<64x128xf32>
    %c3 = arith.constant 3 : index
    %c0_18 = arith.constant 0 : index
    %c0_19 = arith.constant 0 : index
    %c0_20 = arith.constant 0 : index
    %25 = vector.load %arg2[%c3, %c0_18, %c0_19, %c0_20] : memref<4x1x64x128xbf16, #tpu.memory_space<vmem>>, vector<1x1x64x128xbf16>
    %26 = vector.shape_cast %25 : vector<1x1x64x128xbf16> to vector<64x128xbf16>
    %cst_21 = arith.constant dense<0.000000e+00> : vector<64x128xf32>
    %27 = tpu.matmul %26, %0, %cst_21 {dimension_numbers = #tpu.dot_dimension_numbers<[1], [0], [0], [1], [0, 0, 1, 1], [], []>} : vector<64x128xbf16>, vector<128x128xbf16>, vector<64x128xf32> -> vector<64x128xf32>
    %28 = vector.broadcast %1 : vector<1x128xf32> to vector<64x128xf32>
    %29 = arith.addf %27, %28 : vector<64x128xf32>
    %cst_22 = arith.constant 0.000000e+00 : f32
    %30 = vector.broadcast %cst_22 : f32 to vector<64x128xf32>
    %31 = arith.maximumf %29, %30 : vector<64x128xf32>
    %32 = arith.addf %24, %31 : vector<64x128xf32>
    %c0_23 = arith.constant 0 : index
    %c0_24 = arith.constant 0 : index
    %c0_25 = arith.constant 0 : index
    %33 = vector.load %arg5[%c0_23, %c0_24, %c0_25] : memref<1x64x128xf32, #tpu.memory_space<vmem>>, vector<1x64x128xf32>
    %34 = vector.shape_cast %33 : vector<1x64x128xf32> to vector<64x128xf32>
    %35 = vector.shape_cast %32 : vector<64x128xf32> to vector<1x64x128xf32>
    tpu.vector_store %arg5[%c0_23, %c0_24, %c0_25], %35 {strides = array<i32>} : memref<1x64x128xf32, #tpu.memory_space<vmem>>, vector<1x64x128xf32>,
    return
  }
  func.func @transform_0(%arg0: i32, %arg1: i32) -> (i32, i32, i32, i32) {
    %c0_i32 = arith.constant 0 : i32
    %c0_i32_0 = arith.constant 0 : i32
    %c0_i32_1 = arith.constant 0 : i32
    return %c0_i32, %arg0, %arg1, %c0_i32_0 : i32, i32, i32, i32
  }
  func.func @transform_1(%arg0: i32, %arg1: i32) -> (i32, i32) {
    %c0_i32 = arith.constant 0 : i32
    %c0_i32_0 = arith.constant 0 : i32
    %c0_i32_1 = arith.constant 0 : i32
    return %c0_i32, %c0_i32_0 : i32, i32
  }
  func.func @transform_2(%arg0: i32, %arg1: i32) -> (i32, i32) {
    %c0_i32 = arith.constant 0 : i32
    %c0_i32_0 = arith.constant 0 : i32
    %c0_i32_1 = arith.constant 0 : i32
    return %c0_i32, %c0_i32_0 : i32, i32
  }
  func.func @transform_3(%arg0: i32, %arg1: i32) -> (i32, i32, i32) {
    %c0_i32 = arith.constant 0 : i32
    %c0_i32_0 = arith.constant 0 : i32
    return %arg0, %arg1, %c0_i32 : i32, i32, i32
  }
}

module attributes {stable_mosaic.version = 11 : i64} {
  func.func @_transition_kernel_even(%arg0: i32, %arg1: i32, %arg2: memref<4x1x64x128xbf16, #tpu.memory_space<vmem>>, %arg3: memref<128x128xbf16, #tpu.memory_space<vmem>>, %arg4: memref<1x128xf32, #tpu.memory_space<vmem>>, %arg5: memref<1x64x128xf32, #tpu.memory_space<vmem>>) attributes {dimension_semantics = [#tpu.dimension_semantics<parallel>, #tpu.dimension_semantics<parallel>], iteration_bounds = array<i64: 2, 1>, scalar_prefetch = 0 : i64, scratch_operands = 0 : i64, tpu.core_type = #tpu.core_type<tc>, window_params = [{transform_indices = @transform_0, window_bounds = array<i64: 4, 1, 64, 128>}, {pipeline_mode = #tpu.pipeline_mode<synchronous>, transform_indices = @transform_1, window_bounds = array<i64: 128, 128>}, {pipeline_mode = #tpu.pipeline_mode<synchronous>, transform_indices = @transform_2, window_bounds = array<i64: 1, 128>}, {transform_indices = @transform_3, window_bounds = array<i64: 1, 64, 128>}]} {
    %c0 = arith.constant 0 : index
    %c0_0 = arith.constant 0 : index
    %0 = vector.load %arg3[%c0, %c0_0] : memref<128x128xbf16, #tpu.memory_space<vmem>>, vector<128x128xbf16>
    %c0_1 = arith.constant 0 : index
    %c0_2 = arith.constant 0 : index
    %1 = vector.load %arg4[%c0_1, %c0_2] : memref<1x128xf32, #tpu.memory_space<vmem>>, vector<1x128xf32>
    %c0_3 = arith.constant 0 : index
    %c0_4 = arith.constant 0 : index
    %c0_5 = arith.constant 0 : index
    %c0_6 = arith.constant 0 : index
    %2 = vector.load %arg2[%c0_3, %c0_4, %c0_5, %c0_6] : memref<4x1x64x128xbf16, #tpu.memory_space<vmem>>, vector<1x1x64x128xbf16>
    %3 = vector.shape_cast %2 : vector<1x1x64x128xbf16> to vector<64x128xbf16>
    %cst = arith.constant dense<0.000000e+00> : vector<64x128xf32>
    %4 = tpu.matmul %3, %0, %cst {dimension_numbers = #tpu.dot_dimension_numbers<[1], [0], [0], [1], [0, 0, 1, 1], [], []>} : vector<64x128xbf16>, vector<128x128xbf16>, vector<64x128xf32> -> vector<64x128xf32>
    %5 = vector.broadcast %1 : vector<1x128xf32> to vector<64x128xf32>
    %6 = arith.addf %4, %5 : vector<64x128xf32>
    %cst_7 = arith.constant 0.000000e+00 : f32
    %7 = vector.broadcast %cst_7 : f32 to vector<64x128xf32>
    %8 = arith.maximumf %6, %7 : vector<64x128xf32>
    %c1 = arith.constant 1 : index
    %c0_8 = arith.constant 0 : index
    %c0_9 = arith.constant 0 : index
    %c0_10 = arith.constant 0 : index
    %9 = vector.load %arg2[%c1, %c0_8, %c0_9, %c0_10] : memref<4x1x64x128xbf16, #tpu.memory_space<vmem>>, vector<1x1x64x128xbf16>
    %10 = vector.shape_cast %9 : vector<1x1x64x128xbf16> to vector<64x128xbf16>
    %cst_11 = arith.constant dense<0.000000e+00> : vector<64x128xf32>
    %11 = tpu.matmul %10, %0, %cst_11 {dimension_numbers = #tpu.dot_dimension_numbers<[1], [0], [0], [1], [0, 0, 1, 1], [], []>} : vector<64x128xbf16>, vector<128x128xbf16>, vector<64x128xf32> -> vector<64x128xf32>
    %12 = vector.broadcast %1 : vector<1x128xf32> to vector<64x128xf32>
    %13 = arith.addf %11, %12 : vector<64x128xf32>
    %cst_12 = arith.constant 0.000000e+00 : f32
    %14 = vector.broadcast %cst_12 : f32 to vector<64x128xf32>
    %15 = arith.maximumf %13, %14 : vector<64x128xf32>
    %16 = arith.addf %8, %15 : vector<64x128xf32>
    %c2 = arith.constant 2 : index
    %c0_13 = arith.constant 0 : index
    %c0_14 = arith.constant 0 : index
    %c0_15 = arith.constant 0 : index
    %17 = vector.load %arg2[%c2, %c0_13, %c0_14, %c0_15] : memref<4x1x64x128xbf16, #tpu.memory_space<vmem>>, vector<1x1x64x128xbf16>
    %18 = vector.shape_cast %17 : vector<1x1x64x128xbf16> to vector<64x128xbf16>
    %cst_16 = arith.constant dense<0.000000e+00> : vector<64x128xf32>
    %19 = tpu.matmul %18, %0, %cst_16 {dimension_numbers = #tpu.dot_dimension_numbers<[1], [0], [0], [1], [0, 0, 1, 1], [], []>} : vector<64x128xbf16>, vector<128x128xbf16>, vector<64x128xf32> -> vector<64x128xf32>
    %20 = vector.broadcast %1 : vector<1x128xf32> to vector<64x128xf32>
    %21 = arith.addf %19, %20 : vector<64x128xf32>
    %cst_17 = arith.constant 0.000000e+00 : f32
    %22 = vector.broadcast %cst_17 : f32 to vector<64x128xf32>
    %23 = arith.maximumf %21, %22 : vector<64x128xf32>
    %24 = arith.addf %16, %23 : vector<64x128xf32>
    %c3 = arith.constant 3 : index
    %c0_18 = arith.constant 0 : index
    %c0_19 = arith.constant 0 : index
    %c0_20 = arith.constant 0 : index
    %25 = vector.load %arg2[%c3, %c0_18, %c0_19, %c0_20] : memref<4x1x64x128xbf16, #tpu.memory_space<vmem>>, vector<1x1x64x128xbf16>
    %26 = vector.shape_cast %25 : vector<1x1x64x128xbf16> to vector<64x128xbf16>
    %cst_21 = arith.constant dense<0.000000e+00> : vector<64x128xf32>
    %27 = tpu.matmul %26, %0, %cst_21 {dimension_numbers = #tpu.dot_dimension_numbers<[1], [0], [0], [1], [0, 0, 1, 1], [], []>} : vector<64x128xbf16>, vector<128x128xbf16>, vector<64x128xf32> -> vector<64x128xf32>
    %28 = vector.broadcast %1 : vector<1x128xf32> to vector<64x128xf32>
    %29 = arith.addf %27, %28 : vector<64x128xf32>
    %cst_22 = arith.constant 0.000000e+00 : f32
    %30 = vector.broadcast %cst_22 : f32 to vector<64x128xf32>
    %31 = arith.maximumf %29, %30 : vector<64x128xf32>
    %32 = arith.addf %24, %31 : vector<64x128xf32>
    %c0_23 = arith.constant 0 : index
    %c0_24 = arith.constant 0 : index
    %c0_25 = arith.constant 0 : index
    %33 = vector.load %arg5[%c0_23, %c0_24, %c0_25] : memref<1x64x128xf32, #tpu.memory_space<vmem>>, vector<1x64x128xf32>
    %34 = vector.shape_cast %33 : vector<1x64x128xf32> to vector<64x128xf32>
    %35 = vector.shape_cast %32 : vector<64x128xf32> to vector<1x64x128xf32>
    tpu.vector_store %arg5[%c0_23, %c0_24, %c0_25], %35 {strides = array<i32>} : memref<1x64x128xf32, #tpu.memory_space<vmem>>, vector<1x64x128xf32>,
    return
  }
  func.func @transform_0(%arg0: i32, %arg1: i32) -> (i32, i32, i32, i32) {
    %c0_i32 = arith.constant 0 : i32
    %c0_i32_0 = arith.constant 0 : i32
    %c0_i32_1 = arith.constant 0 : i32
    return %c0_i32, %arg0, %arg1, %c0_i32_0 : i32, i32, i32, i32
  }
  func.func @transform_1(%arg0: i32, %arg1: i32) -> (i32, i32) {
    %c0_i32 = arith.constant 0 : i32
    %c0_i32_0 = arith.constant 0 : i32
    %c0_i32_1 = arith.constant 0 : i32
    return %c0_i32, %c0_i32_0 : i32, i32
  }
  func.func @transform_2(%arg0: i32, %arg1: i32) -> (i32, i32) {
    %c0_i32 = arith.constant 0 : i32
    %c0_i32_0 = arith.constant 0 : i32
    %c0_i32_1 = arith.constant 0 : i32
    return %c0_i32, %c0_i32_0 : i32, i32
  }
  func.func @transform_3(%arg0: i32, %arg1: i32) -> (i32, i32, i32) {
    %c0_i32 = arith.constant 0 : i32
    %c0_i32_0 = arith.constant 0 : i32
    return %arg0, %arg1, %c0_i32 : i32, i32, i32
  }
}

</mosaic_0001>

<bundles_post_ra>
// kernel: tpu_custom_call.1
= control target key start
LH: loop header
LB: loop body
LE: loop exit
PB: predicated region body
PF: predicated region fallthrough
CT: control target
= control target key end

     0   :  { %s1610_s0 = inlined_call_operand.hbm [shape: bf16[4,2,64,128], index: 0, kind: input, shape index: {}]   ;;  %s1611_s1 = inlined_call_operand.hbm [shape: bf16[128,128], index: 1, kind: input, shape index: {}]   ;;  %s1612_s2 = inlined_call_operand.vmem [shape: f32[1,128], index: 2, kind: input, shape index: {}]   ;;  %s1613_s3 = inlined_call_operand.hbm [shape: f32[2,64,128], index: 3, kind: output, shape index: {}]  }
   0x1   :  { %1616 = sst [smem:[#allocation14_spill]] %s1611_s1 }
   0x2   :  { %8 = vsyncpa [#allocation3], 0 }
   0x3   :  { %10 = vsyncpa [#allocation3 + $0x1], 0 }
   0x4   :  { %11 = vsyncpa [#allocation6], 0 }
   0x5   :  { %12 = vsyncpa [#allocation4], 0 }
   0x6   :  { %14 = vsyncpa [#allocation4 + $0x1], 0  ;;  %s1356_s12 = smov 0   ;;  %s1358_s13 = smov 0  }
   0x7   :  { %s1360_s14 = smov 0   ;;  %s1362_s15 = smov 0  }
   0x8   :  { %s1364_s16 = smov 0   ;;  %s1366_s17 = smov 0  }
   0x9 LB: > { %s889_s18 = sadd.s32 4294967295, %s1322_s17   ;;  %s890_s19 = sadd.s32 4294967294, %s1322_s17   ;;  %s1322_s17 = sphi %s1366_s17, %s20_s17   ;;  %s1318_s16 = sphi %s1364_s16, %s1631_s16   ;;  %s1314_s15 = sphi %s1362_s15, %s1630_s15   ;;  %s1310_s14 = sphi %s1360_s14, %s1629_s14   ;;  %s1306_s13 = sphi %s1358_s13, %s1628_s13   ;;  %s1302_s12 = sphi %s1356_s12, %s1627_s12  }
   0xa   : > { %s32_s20 = sadd.s32 1, %s1318_s16  ;;  %s41_s21 = sadd.s32 1, %s1310_s14 }
   0xb   : > { %p34_p0 = scmp.ge.s32.totalorder %s32_s20, 2  ;;  %p48_p1 = scmp.ne.s32.totalorder %s1310_s14, %s1306_s13 }
   0xc   : > { %p49_p2 = scmp.eq.s32.totalorder %s1322_s17, 0  ;;  %p54_p3 = scmp.ne.s32.totalorder %s1306_s13, %s1302_s12 }
   0xd   : > { %s1633_s20 = smov (%p34_p0, %s32_s20), 0  ;;  %p1401_p5 = scmp.eq.s32.totalorder %s889_s18, 0 }
   0xe   : > { %p1397_p4 = por %p49_p2, %p48_p1  ;;  %s36_s24 = ssub.s32 %s1318_s16, %s1633_s20 }
   0xf   : > { %p122_p6 = scmp.eq.s32.totalorder %s889_s18, 1  ;;  %p39_p7 = scmp.eq.s32.totalorder %s36_s24, 0 }
  0x10   : > { %p1409_p8 = por %p1401_p5, %p54_p3  ;;  %p128_p10 = scmp.eq.s32.totalorder %s890_s19, 1 }
  0x11   : > { %p1413_p9 = por %p122_p6, %p48_p1  ;;  %p891_p12 = scmp.ge.s32.totalorder %s1322_s17, 1 }
  0x12   : > { %s1619_s25 = scalar_select %p1409_p8, 1, 0 }
  0x13   : > { %s1620_s26 = scalar_select %p1413_p9, 1, 0 }
  0x14   : > { %s1418_s27 = scalar_select %p39_p7, %s1310_s14, %s41_s21  }
  0x15   : > { %p1420_p11 = por %p128_p10, %p54_p3  ;;  %p135_p13 = scmp.lt.s32.totalorder %s1322_s17, 3 }
  0x16   : > { %s1324_s30 = smov [#allocation5]  }
  0x17   : > { %s1621_s28 = scalar_select %p1420_p11, 1, 0 }
  0x18   : > { %p1426_p0 = pnand %p891_p12, %p135_p13  ;;  %s147_s4 = sshll.u32 %s1324_s30, 4  ;;  %s148_s4 = int_to_ptr.vmem [resolvable:$true] %s147_s4 }
  0x19   : > { %s1223_s5 = scalar_lea.vmem %s148_s4, 1024  ;;  %p1231_p11 = scmp.lt.s32.totalorder %s148_s4, %s148_s4 }
  0x1a   : > { %p1118_p1 = pneg %p1426_p0  ;;  %p1224_p3 = scmp.ne.s32.totalorder %s148_s4, %s1223_s5 }
  0x1b   : > { %p1232_p9 = scmp.lt.s32.totalorder %s1223_s5, %s1223_s5 }
  0x1c   : > { %p1119_p2 = pnand %p1118_p1, %p1401_p5 }
  0x1d   : > { %p1233_p8 = por %p1232_p9, %p1231_p11 }
  0x1e   : > { %p1214_p6 = pneg %p1119_p2 }
  0x20   : > { %p1226_p7 = pnand %p1224_p3, %p1214_p6 }
  0x22   : > { %p1227_p10 = pneg %p1226_p7 }
  0x24   : > { %p1234_p12 = pnand %p1233_p8, %p1227_p10 }
  0x26   : > { %1237 = shalt.err (!%p1234_p12)
}
  0x27   : > { %s1325_s6 = smov 64   ;;  %s1326_s7 = smov 4  }
  0x28   : > { %s1623_s1 = sld [smem:[#allocation14_spill]]  ;;  %p893_p13 = scmp.ge.s32.totalorder %s1322_s17, 2 }
  0x2a   : > { %160 = sbr.rel (%p893_p13) target bundleno = 60 (0x3c), region = 24 }
  0x2e   : > { %1121 = dma.hbm_to_vmem [thread:$0]  (!%p1119_p2), %s1623_s1, 1024, %s148_s4, [#allocation6], %s1325_s6, %s1325_s6, %s1326_s7  }
  0x2f   : > { %s164_s10 = sand.u32 1, %s1310_s14   ;;  %s957_s11 = sshll.u32 %s1318_s16, 9 }
  0x30   : > { %s894_s18 = sshll.u32 %s164_s10, 7  ;;  %s176_s24 = scalar_lea.hbm %s1610_s0, %s957_s11 }
  0x31   : > { %s1105_s30 = scalar_select %p1397_p4, [#allocation0], [#allocation10] }
  0x32   : > { %s168_s4 = scalar_lea.vmem [#allocation2], %s894_s18  ;;  %s1327_s7 = smov 1024  }
  0x33   : > { %s189_s5 = sshll.u32 %s168_s4, 4  ;;  %s181_s6 = sld [smem:[%s1105_s30]]   ;;  %s190_s5 = int_to_ptr.vmem [resolvable:$true] %s189_s5 }
  0x34   : > { %1106 = sst [smem:[#allocation9]] (%p1397_p4), %s1327_s7  ;;  %s1328_s8 = smov 512  }
  0x35   : > { %1107 = sst [smem:[#allocation9 + $0x1]] (%p1397_p4), %s1328_s8  ;;  %s1329_s9 = smov 8  }
  0x36   : > { %1108 = sst [smem:[#allocation9 + $0x2]] (%p1397_p4), %s1329_s9  ;;  %s1330_s1 = smov 64  }
  0x37   : > { %1109 = sst [smem:[#allocation9 + $0x3]] (%p1397_p4), %s1330_s1  ;;  %s1331_s18 = smov 4  }
  0x38   : > { %1110 = sst [smem:[#allocation9 + $0x4]] (%p1397_p4), %s1330_s1  ;;  %s165_s21 = scalar_lea.sflag [#allocation3], %s164_s10 }
  0x39   : > { %s897_s11 = sshll.u32 %s181_s6, 26  ;;  %1111 = sst [smem:[#allocation9 + $0x5]] (%p1397_p4), %s1331_s18 }
  0x3a   : > { %s898_s19 = sadd.s32 134217728, %s897_s11  ;;  %s1332_s30 = smov 131072  }
  0x3b   : > { %1112 = dma.general (%p1397_p4), %s176_s24, 2048, %s190_s5, %s165_s21, %s1332_s30, [#allocation9], %s898_s19, 0  }
  0x3c PF: > { %214 = sbr.rel (%p1426_p0) target bundleno = 362 (0x16a), region = 32  ;;  %s1464_s4 = sand.u32 (!%p1426_p0), 1, %s1306_s13  }
  0x3d   : > { %s900_s1 = sshll.u32 (!%p1426_p0), %s1464_s4, 7  ;;  %s217_s6 = scalar_lea.sflag (!%p1426_p0), [#allocation3], %s1464_s4 }
  0x3e   : > { %s1468_s7 = scalar_lea.vmem (!%p1426_p0), [#allocation2], %s900_s1  ;;  %p1624_p8 = scmp.ne.s32.totalorder (!%p1426_p0), %s1619_s25, 0 }
  0x41   : > { %1289 = dma.done.wait (%p1624_p8), %s217_s6, 2048  }
  0x42   : > { %1291 = vsyncadd (%p1624_p8), %s217_s6, 4294965248 }
  0x43   : > { %1293 = dma.done.wait (%p1401_p5), [#allocation6], 1024  }
  0x44   : > { %1295 = vsyncadd (%p1401_p5), [#allocation6], 4294966272  ;;  %v1188_v0 = vld [vmem:[#allocation5 + $0x38] sm:$0xff]   ;;  %v1189_v1 = vld [vmem:[#allocation5 + $0x30] sm:$0xff]   ;;  %s902_s25 = sshll.u32 %s1464_s4, 6  ;;  %s958_s24 = sshll.u32 %s1314_s15, 10 }
  0x45   : > { %1007 = vmatprep.subr.bf16.mxu0 %v1188_v0  ;;  %1031 = vmatprep.subr.bf16.mxu1 %v1188_v0  ;;  %v1190_v2 = vld [vmem:[#allocation5 + $0x28] sm:$0xff]   ;;  %v1478_v3 = vld [vmem:[#allocation5 + $0x20] sm:$0xff]   ;;  %v1192_v6 = vld [vmem:[#allocation5 + $0x18] sm:$0xff]   ;;  %s1537_s29 = scalar_lea.vmem [#allocation7], %s902_s25  ;;  %s1560_s9 = scalar_lea.hbm %s1613_s3, %s958_s24 }
  0x46   : > { %1008 = vmatpush3.bf16.msra.mxu0 %v1188_v0  ;;  %1032 = vmatpush3.bf16.msra.mxu1 %v1188_v0  ;;  %v1196_v4 = vld [vmem:[%s1468_s7] sm:$0xff]   ;;  %v1193_v7 = vld [vmem:[#allocation5 + $0x10] sm:$0xff]   ;;  %v1194_v8 = vld [vmem:[#allocation5 + $0x8] sm:$0xff]   ;;  %s792_s10 = sshll.u32 %s1537_s29, 4  ;;  %s777_s11 = scalar_lea.sflag [#allocation4], %s1464_s4  ;;  %s1554_s10 = int_to_ptr.vmem [resolvable:$true] %s792_s10 }
  0x47   : > { %1009 = vmatprep.subr.bf16.mxu0 %v1189_v1  ;;  %1033 = vmatprep.subr.bf16.mxu1 %v1189_v1  ;;  %v1197_v5 = vld [vmem:[%s1468_s7 + $0x20] sm:$0xff]   ;;  %v1198_v10 = vld [vmem:[%s1468_s7 + $0x8] sm:$0xff]   ;;  %v1200_v12 = vld [vmem:[%s1468_s7 + $0x10] sm:$0xff]   ;;  %s1238_s18 = scalar_lea.vmem %s1554_s10, 1024  ;;  %p1625_p5 = scmp.ne.s32.totalorder %s1620_s26, 0 }
  0x48   : > { %1023 = vmatprep.mubr.bf16.mxu0 %v1196_v4  ;;  %1047 = vmatprep.mubr.bf16.mxu1 %v1197_v5  ;;  %v1195_v9 = vld [vmem:[#allocation5] sm:$0xff]   ;;  %v1199_v11 = vld [vmem:[%s1468_s7 + $0x28] sm:$0xff]   ;;  %v1201_v13 = vld [vmem:[%s1468_s7 + $0x30] sm:$0xff]   ;;  %p1239_p4 = scmp.ne.s32.totalorder %s1554_s10, %s1238_s18  ;;  %s1333_s15 = smov [#allocation7]  }
  0x49   : > { %v1202_v14 = vld [vmem:[%s1468_s7 + $0x18] sm:$0xff]   ;;  %v1204_v16 = vld [vmem:[%s1468_s7 + $0x40] sm:$0xff]   ;;  %v1206_v18 = vld [vmem:[%s1468_s7 + $0x48] sm:$0xff]   ;;  %s1242_s19 = sshll.u32 %s1333_s15, 4  ;;  %s1243_s19 = int_to_ptr.vmem [resolvable:$false] %s1242_s19 }
  0x4a   : > { %1010 = vmatpush3.bf16.msra.mxu0 %v1189_v1  ;;  %1034 = vmatpush3.bf16.msra.mxu1 %v1189_v1  ;;  %v1203_v15 = vld [vmem:[%s1468_s7 + $0x38] sm:$0xff]   ;;  %v1205_v17 = vld [vmem:[%s1468_s7 + $0x60] sm:$0xff]   ;;  %v1207_v19 = vld [vmem:[%s1468_s7 + $0x68] sm:$0xff]   ;;  %p1240_p9 = pnand %p1239_p4, %p1625_p5  ;;  %s1244_s21 = scalar_lea.vmem %s1243_s19, 2048 }
  0x4b   : > { %1011 = vmatprep.subr.bf16.mxu0 %v1190_v2  ;;  %1035 = vmatprep.subr.bf16.mxu1 %v1190_v2  ;;  %v1208_v20 = vld [vmem:[%s1468_s7 + $0x50] sm:$0xff]   ;;  %v1210_v22 = vld [vmem:[%s1468_s7 + $0x58] sm:$0xff]   ;;  %v1507_v36 = vld [vmem:[%s1612_s2] ss:$0 sm:$0xff]  ;;  %p1245_p0 = scmp.lt.s32.totalorder %s1554_s10, %s1243_s19  ;;  %p1246_p1 = scmp.lt.s32.totalorder %s1244_s21, %s1238_s18 }
  0x4c   : > { %v1209_v21 = vld [vmem:[%s1468_s7 + $0x70] sm:$0xff]   ;;  %v1211_v23 = vld [vmem:[%s1468_s7 + $0x78] sm:$0xff]   ;;  %p1241_p11 = pneg %p1240_p9 }
  0x4d   : > { %p1247_p2 = por %p1246_p1, %p1245_p0 }
  0x4e   : > { %1012 = vmatpush3.bf16.msra.mxu0 %v1190_v2  ;;  %1036 = vmatpush3.bf16.msra.mxu1 %v1190_v2 }
  0x4f   : > { %1013 = vmatprep.subr.bf16.mxu0 %v1478_v3  ;;  %1037 = vmatprep.subr.bf16.mxu1 %v1478_v3  ;;  %p1248_p6 = pnand %p1247_p2, %p1241_p11 }
  0x52   : > { %1014 = vmatpush3.bf16.msra.mxu0 %v1478_v3  ;;  %1038 = vmatpush3.bf16.msra.mxu1 %v1478_v3 }
  0x53   : > { %1015 = vmatprep.subr.bf16.mxu0 %v1192_v6  ;;  %1039 = vmatprep.subr.bf16.mxu1 %v1192_v6 }
  0x56   : > { %1016 = vmatpush3.bf16.msra.mxu0 %v1192_v6  ;;  %1040 = vmatpush3.bf16.msra.mxu1 %v1192_v6 }
  0x57   : > { %1017 = vmatprep.subr.bf16.mxu0 %v1193_v7  ;;  %1041 = vmatprep.subr.bf16.mxu1 %v1193_v7 }
  0x5a   : > { %1018 = vmatpush3.bf16.msra.mxu0 %v1193_v7  ;;  %1042 = vmatpush3.bf16.msra.mxu1 %v1193_v7 }
  0x5b   : > { %1019 = vmatprep.subr.bf16.mxu0 %v1194_v8  ;;  %1043 = vmatprep.subr.bf16.mxu1 %v1194_v8 }
  0x5e   : > { %1020 = vmatpush3.bf16.msra.mxu0 %v1194_v8  ;;  %1044 = vmatpush3.bf16.msra.mxu1 %v1194_v8 }
  0x5f   : > { %1021 = vmatprep.subr.bf16.mxu0 %v1195_v9  ;;  %1045 = vmatprep.subr.bf16.mxu1 %v1195_v9 }
  0x62   : > { %1022 = vmatpush3.bf16.msra.mxu0 %v1195_v9  ;;  %1046 = vmatpush3.bf16.msra.mxu1 %v1195_v9 }
  0x63   : > { %1055 = vmatprep.subr.bf16.mxu0 %v1188_v0  ;;  %1079 = vmatprep.subr.bf16.mxu1 %v1188_v0 }
  0x65   : > { %1024 = vmatmul.mubr.bf16.vlgmr.msra.gmra.mxu0 %v1198_v10  ;;  %1048 = vmatmul.mubr.bf16.vlgmr.msra.gmra.mxu1 %v1199_v11 }
  0x66   : > { %1056 = vmatpush3.bf16.msra.mxu0 %v1188_v0  ;;  %1080 = vmatpush3.bf16.msra.mxu1 %v1188_v0 }
  0x67   : > { %1057 = vmatprep.subr.bf16.mxu0 %v1189_v1  ;;  %1081 = vmatprep.subr.bf16.mxu1 %v1189_v1 }
  0x68   : > { %1027 = vmatprep.mubr.bf16.mxu0 %v1200_v12  ;;  %1051 = vmatprep.mubr.bf16.mxu1 %v1201_v13 }
  0x6a   : > { %1058 = vmatpush3.bf16.msra.mxu0 %v1189_v1  ;;  %1082 = vmatpush3.bf16.msra.mxu1 %v1189_v1 }
  0x6b   : > { %1059 = vmatprep.subr.bf16.mxu0 %v1190_v2  ;;  %1083 = vmatprep.subr.bf16.mxu1 %v1190_v2 }
  0x6d   : > { %1028 = vmatmul.mubr.bf16.gmra.mxu0 %v1202_v14  ;;  %1052 = vmatmul.mubr.bf16.gmra.mxu1 %v1203_v15 }
  0x6e   : > { %1060 = vmatpush3.bf16.msra.mxu0 %v1190_v2  ;;  %1084 = vmatpush3.bf16.msra.mxu1 %v1190_v2 }
  0x6f   : > { %1061 = vmatprep.subr.bf16.mxu0 %v1478_v3  ;;  %1085 = vmatprep.subr.bf16.mxu1 %v1478_v3 }
  0x70   : > { %1071 = vmatprep.mubr.bf16.mxu0 %v1204_v16  ;;  %1095 = vmatprep.mubr.bf16.mxu1 %v1205_v17 }
  0x72   : > { %1062 = vmatpush3.bf16.msra.mxu0 %v1478_v3  ;;  %1086 = vmatpush3.bf16.msra.mxu1 %v1478_v3 }
  0x73   : > { %1063 = vmatprep.subr.bf16.mxu0 %v1192_v6  ;;  %1087 = vmatprep.subr.bf16.mxu1 %v1192_v6 }
  0x76   : > { %1064 = vmatpush3.bf16.msra.mxu0 %v1192_v6  ;;  %1088 = vmatpush3.bf16.msra.mxu1 %v1192_v6 }
  0x77   : > { %1065 = vmatprep.subr.bf16.mxu0 %v1193_v7  ;;  %1089 = vmatprep.subr.bf16.mxu1 %v1193_v7 }
  0x7a   : > { %1066 = vmatpush3.bf16.msra.mxu0 %v1193_v7  ;;  %1090 = vmatpush3.bf16.msra.mxu1 %v1193_v7 }
  0x7b   : > { %1067 = vmatprep.subr.bf16.mxu0 %v1194_v8  ;;  %1091 = vmatprep.subr.bf16.mxu1 %v1194_v8 }
  0x7e   : > { %1068 = vmatpush3.bf16.msra.mxu0 %v1194_v8  ;;  %1092 = vmatpush3.bf16.msra.mxu1 %v1194_v8 }
  0x7f   : > { %1069 = vmatprep.subr.bf16.mxu0 %v1195_v9  ;;  %1093 = vmatprep.subr.bf16.mxu1 %v1195_v9 }
  0x82   : > { %1070 = vmatpush3.bf16.msra.mxu0 %v1195_v9  ;;  %1094 = vmatpush3.bf16.msra.mxu1 %v1195_v9 }
  0x85   : > { %1072 = vmatmul.mubr.bf16.vlgmr.msra.gmra.mxu0 %v1206_v18  ;;  %1096 = vmatmul.mubr.bf16.vlgmr.msra.gmra.mxu1 %v1207_v19 }
  0x86   : > { %1075 = vmatprep.mubr.bf16.mxu0 %v1208_v20  ;;  %1099 = vmatprep.mubr.bf16.mxu1 %v1209_v21 }
  0x8d   : > { %1076 = vmatmul.mubr.bf16.gmra.mxu0 %v1210_v22  ;;  %1100 = vmatmul.mubr.bf16.gmra.mxu1 %v1211_v23 }
 0x125   : > { %v1025_v24 = vpop.f32.mrf.mxu0  ;;  %v1049_v25 = vpop.f32.mrf.mxu1 }
 0x126   : > { %v396_v37 = vadd.f32 %v1025_v24, %v1507_v36  ;;  %v502_v38 = vadd.f32 %v1049_v25, %v1507_v36 }
 0x127   : > { %v387_v26 = vpop.f32.mrf.mxu0  ;;  %v493_v27 = vpop.f32.mrf.mxu1 }
 0x128   : > { %v388_v39 = vadd.f32 %v1507_v36, %v387_v26  ;;  %v494_v40 = vadd.f32 %v1507_v36, %v493_v27  ;;  %v420_v49 = vmax.f32 %v396_v37, 0.0  ;;  %v526_v50 = vmax.f32 %v502_v38, 0.0 }
 0x129   : > { %v1026_v28 = vpop.f32.mrf.mxu0  ;;  %v1050_v29 = vpop.f32.mrf.mxu1 }
 0x12a   : > { %v399_v43 = vadd.f32 %v1026_v28, %v1507_v36  ;;  %v505_v44 = vadd.f32 %v1050_v29, %v1507_v36  ;;  %v418_v51 = vmax.f32 %v388_v39, 0.0  ;;  %v524_v52 = vmax.f32 %v494_v40, 0.0 }
 0x12b   : > { %v390_v30 = vpop.f32.mrf.mxu0  ;;  %v496_v31 = vpop.f32.mrf.mxu1  ;;  %v534_v2 = vadd.f32 %v526_v50, %v420_v49 }
 0x12c   : > { %v391_v45 = vadd.f32 %v1507_v36, %v390_v30  ;;  %v497_v46 = vadd.f32 %v1507_v36, %v496_v31  ;;  %v421_v55 = vmax.f32 %v399_v43, 0.0  ;;  %v527_v56 = vmax.f32 %v505_v44, 0.0 }
 0x12d   : > { %v1029_v32 = vpop.f32.mrf.mxu0  ;;  %v1053_v33 = vpop.f32.mrf.mxu1  ;;  %v532_v3 = vadd.f32 %v524_v52, %v418_v51 }
 0x12e   : > { %v412_v47 = vadd.f32 %v1029_v32, %v1507_v36  ;;  %v518_v48 = vadd.f32 %v1053_v33, %v1507_v36  ;;  %v419_v57 = vmax.f32 %v391_v45, 0.0  ;;  %v525_v58 = vmax.f32 %v497_v46, 0.0 }
 0x12f   : > { %v403_v34 = vpop.f32.mrf.mxu0  ;;  %v509_v35 = vpop.f32.mrf.mxu1  ;;  %v535_v12 = vadd.f32 %v527_v56, %v421_v55 }
 0x130   : > { %v424_v59 = vmax.f32 %v412_v47, 0.0  ;;  %v530_v60 = vmax.f32 %v518_v48, 0.0  ;;  %v404_v61 = vadd.f32 %v1507_v36, %v403_v34  ;;  %v510_v4 = vadd.f32 %v1507_v36, %v509_v35 }
 0x131   : > { %v1030_v41 = vpop.f32.mrf.mxu0  ;;  %v1054_v42 = vpop.f32.mrf.mxu1  ;;  %v533_v13 = vadd.f32 %v525_v58, %v419_v57 }
 0x132   : > { %v1524_v5 = vadd.f32 %v1030_v41, %v1507_v36  ;;  %v538_v14 = vadd.f32 %v530_v60, %v424_v59  ;;  %v422_v15 = vmax.f32 %v404_v61, 0.0  ;;  %v521_v18 = vadd.f32 %v1054_v42, %v1507_v36 }
 0x133   : > { %v406_v53 = vpop.f32.mrf.mxu0  ;;  %v512_v54 = vpop.f32.mrf.mxu1  ;;  %v528_v22 = vmax.f32 %v510_v4, 0.0 }
 0x134   : > { %v425_v23 = vmax.f32 %v1524_v5, 0.0  ;;  %v407_v32 = vadd.f32 %v1507_v36, %v406_v53  ;;  %v513_v33 = vadd.f32 %v1507_v36, %v512_v54  ;;  %v531_v44 = vmax.f32 %v521_v18, 0.0 }
 0x135   : > { %v536_v43 = vadd.f32 %v528_v22, %v422_v15 }
 0x136   : > { %v423_v53 = vmax.f32 %v407_v32, 0.0  ;;  %v529_v54 = vmax.f32 %v513_v33, 0.0 }
 0x145   : > { %v1073_v62 = vpop.f32.mrf.mxu0  ;;  %v1097_v63 = vpop.f32.mrf.mxu1 }
 0x146   : > { %v616_v0 = vadd.f32 %v1073_v62, %v1507_v36  ;;  %v730_v1 = vadd.f32 %v1097_v63, %v1507_v36  ;;  %v539_v63 = vadd.f32 %v531_v44, %v425_v23 }
 0x147   : > { %v607_v6 = vpop.f32.mrf.mxu0  ;;  %v721_v7 = vpop.f32.mrf.mxu1 }
 0x148   : > { %v640_v8 = vmax.f32 %v616_v0, 0.0  ;;  %v754_v9 = vmax.f32 %v730_v1, 0.0  ;;  %v608_v10 = vadd.f32 %v1507_v36, %v607_v6  ;;  %v722_v11 = vadd.f32 %v1507_v36, %v721_v7 }
 0x149   : > { %v1074_v16 = vpop.f32.mrf.mxu0  ;;  %v1098_v17 = vpop.f32.mrf.mxu1 }
 0x14a   : > { %v648_v19 = vadd.f32 %v640_v8, %v534_v2  ;;  %v638_v20 = vmax.f32 %v608_v10, 0.0  ;;  %v619_v21 = vadd.f32 %v1074_v16, %v1507_v36  ;;  %v752_v24 = vmax.f32 %v722_v11, 0.0 }
 0x14b   : > { %v733_v25 = vadd.f32 %v1098_v17, %v1507_v36  ;;  %v610_v26 = vpop.f32.mrf.mxu0  ;;  %v724_v27 = vpop.f32.mrf.mxu1  ;;  %v537_v8 = vadd.f32 %v529_v54, %v423_v53 }
 0x14c   : > { %v762_v28 = vadd.f32 %v754_v9, %v648_v19  ;;  %v646_v29 = vadd.f32 %v638_v20, %v532_v3  ;;  %v641_v30 = vmax.f32 %v619_v21, 0.0  ;;  %v611_v31 = vadd.f32 %v1507_v36, %v610_v26 }
 0x14d   : > { %v755_v34 = vmax.f32 %v733_v25, 0.0  ;;  %v725_v35 = vadd.f32 %v1507_v36, %v724_v27  ;;  %v1077_v37 = vpop.f32.mrf.mxu0  ;;  %v1101_v38 = vpop.f32.mrf.mxu1 }
 0x14e   : > { %770 = vst [vmem:[%s1537_s29 + $0x10] sm:$0xff] %v762_v28  ;;  %v760_v39 = vadd.f32 %v752_v24, %v646_v29  ;;  %v649_v40 = vadd.f32 %v641_v30, %v535_v12  ;;  %v639_v41 = vmax.f32 %v611_v31, 0.0  ;;  %v632_v42 = vadd.f32 %v1077_v37, %v1507_v36 }
 0x14f   : > { %v753_v45 = vmax.f32 %v725_v35, 0.0  ;;  %v746_v46 = vadd.f32 %v1101_v38, %v1507_v36  ;;  %v623_v47 = vpop.f32.mrf.mxu0  ;;  %v737_v48 = vpop.f32.mrf.mxu1 }
 0x150   : > { %768 = vst [vmem:[%s1537_s29] sm:$0xff] %v760_v39  ;;  %v763_v49 = vadd.f32 %v755_v34, %v649_v40  ;;  %v647_v50 = vadd.f32 %v639_v41, %v533_v13  ;;  %v644_v51 = vmax.f32 %v632_v42, 0.0  ;;  %v624_v52 = vadd.f32 %v1507_v36, %v623_v47 }
 0x151   : > { %v758_v55 = vmax.f32 %v746_v46, 0.0  ;;  %v738_v56 = vadd.f32 %v1507_v36, %v737_v48  ;;  %v1078_v57 = vpop.f32.mrf.mxu0  ;;  %v1102_v58 = vpop.f32.mrf.mxu1 }
 0x152   : > { %771 = vst [vmem:[%s1537_s29 + $0x18] sm:$0xff] %v763_v49  ;;  %v761_v59 = vadd.f32 %v753_v45, %v647_v50  ;;  %v652_v60 = vadd.f32 %v644_v51, %v538_v14  ;;  %v642_v61 = vmax.f32 %v624_v52, 0.0  ;;  %v635_v62 = vadd.f32 %v1078_v57, %v1507_v36 }
 0x153   : > { %v756_v0 = vmax.f32 %v738_v56, 0.0  ;;  %v749_v1 = vadd.f32 %v1102_v58, %v1507_v36  ;;  %v626_v2 = vpop.f32.mrf.mxu0  ;;  %v740_v3 = vpop.f32.mrf.mxu1 }
 0x154   : > { %769 = vst [vmem:[%s1537_s29 + $0x8] sm:$0xff] %v761_v59  ;;  %v766_v4 = vadd.f32 %v758_v55, %v652_v60  ;;  %v650_v5 = vadd.f32 %v642_v61, %v536_v43  ;;  %v645_v6 = vmax.f32 %v635_v62, 0.0  ;;  %v627_v7 = vadd.f32 %v1507_v36, %v626_v2 }
 0x155   : > { %v741_v9 = vadd.f32 %v1507_v36, %v740_v3  ;;  %v759_v12 = vmax.f32 %v749_v1, 0.0 }
 0x156   : > { %774 = vst [vmem:[%s1537_s29 + $0x30] sm:$0xff] %v766_v4  ;;  %v764_v10 = vadd.f32 %v756_v0, %v650_v5  ;;  %v653_v11 = vadd.f32 %v645_v6, %v539_v63  ;;  %v643_v13 = vmax.f32 %v627_v7, 0.0 }
 0x157   : > { %v757_v16 = vmax.f32 %v741_v9, 0.0 }
 0x158   : > { %772 = vst [vmem:[%s1537_s29 + $0x20] sm:$0xff] %v764_v10  ;;  %v767_v14 = vadd.f32 %v759_v12, %v653_v11  ;;  %v651_v15 = vadd.f32 %v643_v13, %v537_v8 }
 0x15a   : > { %775 = vst [vmem:[%s1537_s29 + $0x38] sm:$0xff] %v767_v14  ;;  %v765_v36 = vadd.f32 %v757_v16, %v651_v15 }
 0x15c   : > { %773 = vst [vmem:[%s1537_s29 + $0x28] sm:$0xff] %v765_v36 }
 0x15d   : > { %1251 = shalt.err (!%p1248_p6)
}
 0x15e   : > { %s1252_s30 = scalar_lea.hbm %s1560_s9, 1024  ;;  %s1256_s7 = scalar_lea.hbm %s1613_s3, 2048 }
 0x15f   : > { %p1253_p3 = scmp.ne.s32.totalorder %s1560_s9, %s1252_s30  ;;  %p1257_p12 = scmp.lt.s32.totalorder %s1560_s9, %s1613_s3 }
 0x160   : > { %p1258_p8 = scmp.lt.s32.totalorder %s1256_s7, %s1252_s30 }
 0x161   : > { %p1254_p7 = pnand %p1253_p3, %p1625_p5 }
 0x162   : > { %p1259_p4 = por %p1258_p8, %p1257_p12 }
 0x163   : > { %p1255_p10 = pneg %p1254_p7 }
 0x165   : > { %p1260_p9 = pnand %p1259_p4, %p1255_p10 }
 0x167   : > { %1263 = shalt.err (!%p1260_p9)
}
 0x168   : > { %s1334_s25 = smov 128   ;;  %s1335_s29 = smov 8  }
 0x169   : > { %1116 = dma.vmem_to_hbm [thread:$0]  (%p1625_p5), %s1554_s10, 1024, %s1560_s9, %s777_s11, %s1334_s25, %s1334_s25, %s1335_s29  }
 0x16a PF: > { %s807_s24 = sand.u32 1, %s1302_s12   ;;  %p1626_p11 = scmp.ne.s32.totalorder %s1621_s28, 0 }
 0x16b   : > { %s808_s5 = scalar_lea.sflag [#allocation4], %s807_s24 }
 0x16c   : > { %p1123_p0 = pnand %p893_p13, %p1626_p11 }
 0x16e   : > { %p1124_p1 = pneg %p1123_p0 }
 0x170   : > { %1297 = dma.done.wait (%p1124_p1), %s808_s5, 1024  }
 0x171   : > { %1299 = vsyncadd (%p1124_p1), %s808_s5, 4294966272  ;;  %s20_s17 = sadd.s32 1, %s1322_s17   ;;  %s1627_s12 = smov %s1306_s13 }
 0x172   : > { %p17_p2 = scmp.ge.s32.totalorder %s20_s17, 4   ;;  %s1628_s13 = smov %s1310_s14 }
 0x173   : > { %s1629_s14 = smov %s1418_s27  ;;  %s1630_s15 = smov %s1318_s16 }
 0x174   : > { %s1631_s16 = smov %s1633_s20  ;;  %19 = sbr.rel (!%p17_p2) target bundleno = 9 (0x9), region = 89 }
 0x179   :  { %813 = vsyncpa [#allocation3], 1 }
 0x17a   :  { %815 = vsyncpa [#allocation3 + $0x1], 1 }
 0x17b   :  { %816 = vsyncpa [#allocation6], 1 }
 0x17c   :  { %817 = vsyncpa [#allocation4], 1 }
 0x17d   :  { %819 = vsyncpa [#allocation4 + $0x1], 1 }

// kernel: tpu_custom_call.1
= control target key start
LH: loop header
LB: loop body
LE: loop exit
PB: predicated region body
PF: predicated region fallthrough
CT: control target
= control target key end

     0   :  { %s1610_s0 = inlined_call_operand.hbm [shape: bf16[4,2,64,128], index: 0, kind: input, shape index: {}]   ;;  %s1611_s1 = inlined_call_operand.hbm [shape: bf16[128,128], index: 1, kind: input, shape index: {}]   ;;  %s1612_s2 = inlined_call_operand.vmem [shape: f32[1,128], index: 2, kind: input, shape index: {}]   ;;  %s1613_s3 = inlined_call_operand.hbm [shape: f32[2,64,128], index: 3, kind: output, shape index: {}]  }
   0x1   :  { %1616 = sst [smem:[#allocation14_spill]] %s1611_s1 }
   0x2   :  { %8 = vsyncpa [#allocation3], 0 }
   0x3   :  { %10 = vsyncpa [#allocation3 + $0x1], 0 }
   0x4   :  { %11 = vsyncpa [#allocation6], 0 }
   0x5   :  { %12 = vsyncpa [#allocation4], 0 }
   0x6   :  { %14 = vsyncpa [#allocation4 + $0x1], 0  ;;  %s1356_s12 = smov 0   ;;  %s1358_s13 = smov 0  }
   0x7   :  { %s1360_s14 = smov 0   ;;  %s1362_s15 = smov 0  }
   0x8   :  { %s1364_s16 = smov 0   ;;  %s1366_s17 = smov 0  }
   0x9 LB: > { %s889_s18 = sadd.s32 4294967295, %s1322_s17   ;;  %s890_s19 = sadd.s32 4294967294, %s1322_s17   ;;  %s1322_s17 = sphi %s1366_s17, %s20_s17   ;;  %s1318_s16 = sphi %s1364_s16, %s1631_s16   ;;  %s1314_s15 = sphi %s1362_s15, %s1630_s15   ;;  %s1310_s14 = sphi %s1360_s14, %s1629_s14   ;;  %s1306_s13 = sphi %s1358_s13, %s1628_s13   ;;  %s1302_s12 = sphi %s1356_s12, %s1627_s12  }
   0xa   : > { %s32_s20 = sadd.s32 1, %s1318_s16  ;;  %s41_s21 = sadd.s32 1, %s1310_s14 }
   0xb   : > { %p34_p0 = scmp.ge.s32.totalorder %s32_s20, 2  ;;  %p48_p1 = scmp.ne.s32.totalorder %s1310_s14, %s1306_s13 }
   0xc   : > { %p49_p2 = scmp.eq.s32.totalorder %s1322_s17, 0  ;;  %p54_p3 = scmp.ne.s32.totalorder %s1306_s13, %s1302_s12 }
   0xd   : > { %s1633_s20 = smov (%p34_p0, %s32_s20), 0  ;;  %p1401_p5 = scmp.eq.s32.totalorder %s889_s18, 0 }
   0xe   : > { %p1397_p4 = por %p49_p2, %p48_p1  ;;  %s36_s24 = ssub.s32 %s1318_s16, %s1633_s20 }
   0xf   : > { %p122_p6 = scmp.eq.s32.totalorder %s889_s18, 1  ;;  %p39_p7 = scmp.eq.s32.totalorder %s36_s24, 0 }
  0x10   : > { %p1409_p8 = por %p1401_p5, %p54_p3  ;;  %p128_p10 = scmp.eq.s32.totalorder %s890_s19, 1 }
  0x11   : > { %p1413_p9 = por %p122_p6, %p48_p1  ;;  %p891_p12 = scmp.ge.s32.totalorder %s1322_s17, 1 }
  0x12   : > { %s1619_s25 = scalar_select %p1409_p8, 1, 0 }
  0x13   : > { %s1620_s26 = scalar_select %p1413_p9, 1, 0 }
  0x14   : > { %s1418_s27 = scalar_select %p39_p7, %s1310_s14, %s41_s21  }
  0x15   : > { %p1420_p11 = por %p128_p10, %p54_p3  ;;  %p135_p13 = scmp.lt.s32.totalorder %s1322_s17, 3 }
  0x16   : > { %s1324_s30 = smov [#allocation5]  }
  0x17   : > { %s1621_s28 = scalar_select %p1420_p11, 1, 0 }
  0x18   : > { %p1426_p0 = pnand %p891_p12, %p135_p13  ;;  %s147_s4 = sshll.u32 %s1324_s30, 4  ;;  %s148_s4 = int_to_ptr.vmem [resolvable:$true] %s147_s4 }
  0x19   : > { %s1223_s5 = scalar_lea.vmem %s148_s4, 1024  ;;  %p1231_p11 = scmp.lt.s32.totalorder %s148_s4, %s148_s4 }
  0x1a   : > { %p1118_p1 = pneg %p1426_p0  ;;  %p1224_p3 = scmp.ne.s32.totalorder %s148_s4, %s1223_s5 }
  0x1b   : > { %p1232_p9 = scmp.lt.s32.totalorder %s1223_s5, %s1223_s5 }
  0x1c   : > { %p1119_p2 = pnand %p1118_p1, %p1401_p5 }
  0x1d   : > { %p1233_p8 = por %p1232_p9, %p1231_p11 }
  0x1e   : > { %p1214_p6 = pneg %p1119_p2 }
  0x20   : > { %p1226_p7 = pnand %p1224_p3, %p1214_p6 }
  0x22   : > { %p1227_p10 = pneg %p1226_p7 }
  0x24   : > { %p1234_p12 = pnand %p1233_p8, %p1227_p10 }
  0x26   : > { %1237 = shalt.err (!%p1234_p12)
}
  0x27   : > { %s1325_s6 = smov 64   ;;  %s1326_s7 = smov 4  }
  0x28   : > { %s1623_s1 = sld [smem:[#allocation14_spill]]  ;;  %p893_p13 = scmp.ge.s32.totalorder %s1322_s17, 2 }
  0x2a   : > { %160 = sbr.rel (%p893_p13) target bundleno = 60 (0x3c), region = 24 }
  0x2e   : > { %1121 = dma.hbm_to_vmem [thread:$0]  (!%p1119_p2), %s1623_s1, 1024, %s148_s4, [#allocation6], %s1325_s6, %s1325_s6, %s1326_s7  }
  0x2f   : > { %s164_s10 = sand.u32 1, %s1310_s14   ;;  %s957_s11 = sshll.u32 %s1318_s16, 9 }
  0x30   : > { %s894_s18 = sshll.u32 %s164_s10, 7  ;;  %s176_s24 = scalar_lea.hbm %s1610_s0, %s957_s11 }
  0x31   : > { %s1105_s30 = scalar_select %p1397_p4, [#allocation0], [#allocation10] }
  0x32   : > { %s168_s4 = scalar_lea.vmem [#allocation2], %s894_s18  ;;  %s1327_s7 = smov 1024  }
  0x33   : > { %s189_s5 = sshll.u32 %s168_s4, 4  ;;  %s181_s6 = sld [smem:[%s1105_s30]]   ;;  %s190_s5 = int_to_ptr.vmem [resolvable:$true] %s189_s5 }
  0x34   : > { %1106 = sst [smem:[#allocation9]] (%p1397_p4), %s1327_s7  ;;  %s1328_s8 = smov 512  }
  0x35   : > { %1107 = sst [smem:[#allocation9 + $0x1]] (%p1397_p4), %s1328_s8  ;;  %s1329_s9 = smov 8  }
  0x36   : > { %1108 = sst [smem:[#allocation9 + $0x2]] (%p1397_p4), %s1329_s9  ;;  %s1330_s1 = smov 64  }
  0x37   : > { %1109 = sst [smem:[#allocation9 + $0x3]] (%p1397_p4), %s1330_s1  ;;  %s1331_s18 = smov 4  }
  0x38   : > { %1110 = sst [smem:[#allocation9 + $0x4]] (%p1397_p4), %s1330_s1  ;;  %s165_s21 = scalar_lea.sflag [#allocation3], %s164_s10 }
  0x39   : > { %s897_s11 = sshll.u32 %s181_s6, 26  ;;  %1111 = sst [smem:[#allocation9 + $0x5]] (%p1397_p4), %s1331_s18 }
  0x3a   : > { %s898_s19 = sadd.s32 134217728, %s897_s11  ;;  %s1332_s30 = smov 131072  }
  0x3b   : > { %1112 = dma.general (%p1397_p4), %s176_s24, 2048, %s190_s5, %s165_s21, %s1332_s30, [#allocation9], %s898_s19, 0  }
  0x3c PF: > { %214 = sbr.rel (%p1426_p0) target bundleno = 362 (0x16a), region = 32  ;;  %s1464_s4 = sand.u32 (!%p1426_p0), 1, %s1306_s13  }
  0x3d   : > { %s900_s1 = sshll.u32 (!%p1426_p0), %s1464_s4, 7  ;;  %s217_s6 = scalar_lea.sflag (!%p1426_p0), [#allocation3], %s1464_s4 }
  0x3e   : > { %s1468_s7 = scalar_lea.vmem (!%p1426_p0), [#allocation2], %s900_s1  ;;  %p1624_p8 = scmp.ne.s32.totalorder (!%p1426_p0), %s1619_s25, 0 }
  0x41   : > { %1289 = dma.done.wait (%p1624_p8), %s217_s6, 2048  }
  0x42   : > { %1291 = vsyncadd (%p1624_p8), %s217_s6, 4294965248 }
  0x43   : > { %1293 = dma.done.wait (%p1401_p5), [#allocation6], 1024  }
  0x44   : > { %1295 = vsyncadd (%p1401_p5), [#allocation6], 4294966272  ;;  %v1188_v0 = vld [vmem:[#allocation5 + $0x38] sm:$0xff]   ;;  %v1189_v1 = vld [vmem:[#allocation5 + $0x30] sm:$0xff]   ;;  %s902_s25 = sshll.u32 %s1464_s4, 6  ;;  %s958_s24 = sshll.u32 %s1314_s15, 10 }
  0x45   : > { %1007 = vmatprep.subr.bf16.mxu0 %v1188_v0  ;;  %1031 = vmatprep.subr.bf16.mxu1 %v1188_v0  ;;  %v1190_v2 = vld [vmem:[#allocation5 + $0x28] sm:$0xff]   ;;  %v1478_v3 = vld [vmem:[#allocation5 + $0x20] sm:$0xff]   ;;  %v1192_v6 = vld [vmem:[#allocation5 + $0x18] sm:$0xff]   ;;  %s1537_s29 = scalar_lea.vmem [#allocation7], %s902_s25  ;;  %s1560_s9 = scalar_lea.hbm %s1613_s3, %s958_s24 }
  0x46   : > { %1008 = vmatpush3.bf16.msra.mxu0 %v1188_v0  ;;  %1032 = vmatpush3.bf16.msra.mxu1 %v1188_v0  ;;  %v1196_v4 = vld [vmem:[%s1468_s7] sm:$0xff]   ;;  %v1193_v7 = vld [vmem:[#allocation5 + $0x10] sm:$0xff]   ;;  %v1194_v8 = vld [vmem:[#allocation5 + $0x8] sm:$0xff]   ;;  %s792_s10 = sshll.u32 %s1537_s29, 4  ;;  %s777_s11 = scalar_lea.sflag [#allocation4], %s1464_s4  ;;  %s1554_s10 = int_to_ptr.vmem [resolvable:$true] %s792_s10 }
  0x47   : > { %1009 = vmatprep.subr.bf16.mxu0 %v1189_v1  ;;  %1033 = vmatprep.subr.bf16.mxu1 %v1189_v1  ;;  %v1197_v5 = vld [vmem:[%s1468_s7 + $0x20] sm:$0xff]   ;;  %v1198_v10 = vld [vmem:[%s1468_s7 + $0x8] sm:$0xff]   ;;  %v1200_v12 = vld [vmem:[%s1468_s7 + $0x10] sm:$0xff]   ;;  %s1238_s18 = scalar_lea.vmem %s1554_s10, 1024  ;;  %p1625_p5 = scmp.ne.s32.totalorder %s1620_s26, 0 }
  0x48   : > { %1023 = vmatprep.mubr.bf16.mxu0 %v1196_v4  ;;  %1047 = vmatprep.mubr.bf16.mxu1 %v1197_v5  ;;  %v1195_v9 = vld [vmem:[#allocation5] sm:$0xff]   ;;  %v1199_v11 = vld [vmem:[%s1468_s7 + $0x28] sm:$0xff]   ;;  %v1201_v13 = vld [vmem:[%s1468_s7 + $0x30] sm:$0xff]   ;;  %p1239_p4 = scmp.ne.s32.totalorder %s1554_s10, %s1238_s18  ;;  %s1333_s15 = smov [#allocation7]  }
  0x49   : > { %v1202_v14 = vld [vmem:[%s1468_s7 + $0x18] sm:$0xff]   ;;  %v1204_v16 = vld [vmem:[%s1468_s7 + $0x40] sm:$0xff]   ;;  %v1206_v18 = vld [vmem:[%s1468_s7 + $0x48] sm:$0xff]   ;;  %s1242_s19 = sshll.u32 %s1333_s15, 4  ;;  %s1243_s19 = int_to_ptr.vmem [resolvable:$false] %s1242_s19 }
  0x4a   : > { %1010 = vmatpush3.bf16.msra.mxu0 %v1189_v1  ;;  %1034 = vmatpush3.bf16.msra.mxu1 %v1189_v1  ;;  %v1203_v15 = vld [vmem:[%s1468_s7 + $0x38] sm:$0xff]   ;;  %v1205_v17 = vld [vmem:[%s1468_s7 + $0x60] sm:$0xff]   ;;  %v1207_v19 = vld [vmem:[%s1468_s7 + $0x68] sm:$0xff]   ;;  %p1240_p9 = pnand %p1239_p4, %p1625_p5  ;;  %s1244_s21 = scalar_lea.vmem %s1243_s19, 2048 }
  0x4b   : > { %1011 = vmatprep.subr.bf16.mxu0 %v1190_v2  ;;  %1035 = vmatprep.subr.bf16.mxu1 %v1190_v2  ;;  %v1208_v20 = vld [vmem:[%s1468_s7 + $0x50] sm:$0xff]   ;;  %v1210_v22 = vld [vmem:[%s1468_s7 + $0x58] sm:$0xff]   ;;  %v1507_v36 = vld [vmem:[%s1612_s2] ss:$0 sm:$0xff]  ;;  %p1245_p0 = scmp.lt.s32.totalorder %s1554_s10, %s1243_s19  ;;  %p1246_p1 = scmp.lt.s32.totalorder %s1244_s21, %s1238_s18 }
  0x4c   : > { %v1209_v21 = vld [vmem:[%s1468_s7 + $0x70] sm:$0xff]   ;;  %v1211_v23 = vld [vmem:[%s1468_s7 + $0x78] sm:$0xff]   ;;  %p1241_p11 = pneg %p1240_p9 }
  0x4d   : > { %p1247_p2 = por %p1246_p1, %p1245_p0 }
  0x4e   : > { %1012 = vmatpush3.bf16.msra.mxu0 %v1190_v2  ;;  %1036 = vmatpush3.bf16.msra.mxu1 %v1190_v2 }
  0x4f   : > { %1013 = vmatprep.subr.bf16.mxu0 %v1478_v3  ;;  %1037 = vmatprep.subr.bf16.mxu1 %v1478_v3  ;;  %p1248_p6 = pnand %p1247_p2, %p1241_p11 }
  0x52   : > { %1014 = vmatpush3.bf16.msra.mxu0 %v1478_v3  ;;  %1038 = vmatpush3.bf16.msra.mxu1 %v1478_v3 }
  0x53   : > { %1015 = vmatprep.subr.bf16.mxu0 %v1192_v6  ;;  %1039 = vmatprep.subr.bf16.mxu1 %v1192_v6 }
  0x56   : > { %1016 = vmatpush3.bf16.msra.mxu0 %v1192_v6  ;;  %1040 = vmatpush3.bf16.msra.mxu1 %v1192_v6 }
  0x57   : > { %1017 = vmatprep.subr.bf16.mxu0 %v1193_v7  ;;  %1041 = vmatprep.subr.bf16.mxu1 %v1193_v7 }
  0x5a   : > { %1018 = vmatpush3.bf16.msra.mxu0 %v1193_v7  ;;  %1042 = vmatpush3.bf16.msra.mxu1 %v1193_v7 }
  0x5b   : > { %1019 = vmatprep.subr.bf16.mxu0 %v1194_v8  ;;  %1043 = vmatprep.subr.bf16.mxu1 %v1194_v8 }
  0x5e   : > { %1020 = vmatpush3.bf16.msra.mxu0 %v1194_v8  ;;  %1044 = vmatpush3.bf16.msra.mxu1 %v1194_v8 }
  0x5f   : > { %1021 = vmatprep.subr.bf16.mxu0 %v1195_v9  ;;  %1045 = vmatprep.subr.bf16.mxu1 %v1195_v9 }
  0x62   : > { %1022 = vmatpush3.bf16.msra.mxu0 %v1195_v9  ;;  %1046 = vmatpush3.bf16.msra.mxu1 %v1195_v9 }
  0x63   : > { %1055 = vmatprep.subr.bf16.mxu0 %v1188_v0  ;;  %1079 = vmatprep.subr.bf16.mxu1 %v1188_v0 }
  0x65   : > { %1024 = vmatmul.mubr.bf16.vlgmr.msra.gmra.mxu0 %v1198_v10  ;;  %1048 = vmatmul.mubr.bf16.vlgmr.msra.gmra.mxu1 %v1199_v11 }
  0x66   : > { %1056 = vmatpush3.bf16.msra.mxu0 %v1188_v0  ;;  %1080 = vmatpush3.bf16.msra.mxu1 %v1188_v0 }
  0x67   : > { %1057 = vmatprep.subr.bf16.mxu0 %v1189_v1  ;;  %1081 = vmatprep.subr.bf16.mxu1 %v1189_v1 }
  0x68   : > { %1027 = vmatprep.mubr.bf16.mxu0 %v1200_v12  ;;  %1051 = vmatprep.mubr.bf16.mxu1 %v1201_v13 }
  0x6a   : > { %1058 = vmatpush3.bf16.msra.mxu0 %v1189_v1  ;;  %1082 = vmatpush3.bf16.msra.mxu1 %v1189_v1 }
  0x6b   : > { %1059 = vmatprep.subr.bf16.mxu0 %v1190_v2  ;;  %1083 = vmatprep.subr.bf16.mxu1 %v1190_v2 }
  0x6d   : > { %1028 = vmatmul.mubr.bf16.gmra.mxu0 %v1202_v14  ;;  %1052 = vmatmul.mubr.bf16.gmra.mxu1 %v1203_v15 }
  0x6e   : > { %1060 = vmatpush3.bf16.msra.mxu0 %v1190_v2  ;;  %1084 = vmatpush3.bf16.msra.mxu1 %v1190_v2 }
  0x6f   : > { %1061 = vmatprep.subr.bf16.mxu0 %v1478_v3  ;;  %1085 = vmatprep.subr.bf16.mxu1 %v1478_v3 }
  0x70   : > { %1071 = vmatprep.mubr.bf16.mxu0 %v1204_v16  ;;  %1095 = vmatprep.mubr.bf16.mxu1 %v1205_v17 }
  0x72   : > { %1062 = vmatpush3.bf16.msra.mxu0 %v1478_v3  ;;  %1086 = vmatpush3.bf16.msra.mxu1 %v1478_v3 }
  0x73   : > { %1063 = vmatprep.subr.bf16.mxu0 %v1192_v6  ;;  %1087 = vmatprep.subr.bf16.mxu1 %v1192_v6 }
  0x76   : > { %1064 = vmatpush3.bf16.msra.mxu0 %v1192_v6  ;;  %1088 = vmatpush3.bf16.msra.mxu1 %v1192_v6 }
  0x77   : > { %1065 = vmatprep.subr.bf16.mxu0 %v1193_v7  ;;  %1089 = vmatprep.subr.bf16.mxu1 %v1193_v7 }
  0x7a   : > { %1066 = vmatpush3.bf16.msra.mxu0 %v1193_v7  ;;  %1090 = vmatpush3.bf16.msra.mxu1 %v1193_v7 }
  0x7b   : > { %1067 = vmatprep.subr.bf16.mxu0 %v1194_v8  ;;  %1091 = vmatprep.subr.bf16.mxu1 %v1194_v8 }
  0x7e   : > { %1068 = vmatpush3.bf16.msra.mxu0 %v1194_v8  ;;  %1092 = vmatpush3.bf16.msra.mxu1 %v1194_v8 }
  0x7f   : > { %1069 = vmatprep.subr.bf16.mxu0 %v1195_v9  ;;  %1093 = vmatprep.subr.bf16.mxu1 %v1195_v9 }
  0x82   : > { %1070 = vmatpush3.bf16.msra.mxu0 %v1195_v9  ;;  %1094 = vmatpush3.bf16.msra.mxu1 %v1195_v9 }
  0x85   : > { %1072 = vmatmul.mubr.bf16.vlgmr.msra.gmra.mxu0 %v1206_v18  ;;  %1096 = vmatmul.mubr.bf16.vlgmr.msra.gmra.mxu1 %v1207_v19 }
  0x86   : > { %1075 = vmatprep.mubr.bf16.mxu0 %v1208_v20  ;;  %1099 = vmatprep.mubr.bf16.mxu1 %v1209_v21 }
  0x8d   : > { %1076 = vmatmul.mubr.bf16.gmra.mxu0 %v1210_v22  ;;  %1100 = vmatmul.mubr.bf16.gmra.mxu1 %v1211_v23 }
 0x125   : > { %v1025_v24 = vpop.f32.mrf.mxu0  ;;  %v1049_v25 = vpop.f32.mrf.mxu1 }
 0x126   : > { %v396_v37 = vadd.f32 %v1025_v24, %v1507_v36  ;;  %v502_v38 = vadd.f32 %v1049_v25, %v1507_v36 }
 0x127   : > { %v387_v26 = vpop.f32.mrf.mxu0  ;;  %v493_v27 = vpop.f32.mrf.mxu1 }
 0x128   : > { %v388_v39 = vadd.f32 %v1507_v36, %v387_v26  ;;  %v494_v40 = vadd.f32 %v1507_v36, %v493_v27  ;;  %v420_v49 = vmax.f32 %v396_v37, 0.0  ;;  %v526_v50 = vmax.f32 %v502_v38, 0.0 }
 0x129   : > { %v1026_v28 = vpop.f32.mrf.mxu0  ;;  %v1050_v29 = vpop.f32.mrf.mxu1 }
 0x12a   : > { %v399_v43 = vadd.f32 %v1026_v28, %v1507_v36  ;;  %v505_v44 = vadd.f32 %v1050_v29, %v1507_v36  ;;  %v418_v51 = vmax.f32 %v388_v39, 0.0  ;;  %v524_v52 = vmax.f32 %v494_v40, 0.0 }
 0x12b   : > { %v390_v30 = vpop.f32.mrf.mxu0  ;;  %v496_v31 = vpop.f32.mrf.mxu1  ;;  %v534_v2 = vadd.f32 %v526_v50, %v420_v49 }
 0x12c   : > { %v391_v45 = vadd.f32 %v1507_v36, %v390_v30  ;;  %v497_v46 = vadd.f32 %v1507_v36, %v496_v31  ;;  %v421_v55 = vmax.f32 %v399_v43, 0.0  ;;  %v527_v56 = vmax.f32 %v505_v44, 0.0 }
 0x12d   : > { %v1029_v32 = vpop.f32.mrf.mxu0  ;;  %v1053_v33 = vpop.f32.mrf.mxu1  ;;  %v532_v3 = vadd.f32 %v524_v52, %v418_v51 }
 0x12e   : > { %v412_v47 = vadd.f32 %v1029_v32, %v1507_v36  ;;  %v518_v48 = vadd.f32 %v1053_v33, %v1507_v36  ;;  %v419_v57 = vmax.f32 %v391_v45, 0.0  ;;  %v525_v58 = vmax.f32 %v497_v46, 0.0 }
 0x12f   : > { %v403_v34 = vpop.f32.mrf.mxu0  ;;  %v509_v35 = vpop.f32.mrf.mxu1  ;;  %v535_v12 = vadd.f32 %v527_v56, %v421_v55 }
 0x130   : > { %v424_v59 = vmax.f32 %v412_v47, 0.0  ;;  %v530_v60 = vmax.f32 %v518_v48, 0.0  ;;  %v404_v61 = vadd.f32 %v1507_v36, %v403_v34  ;;  %v510_v4 = vadd.f32 %v1507_v36, %v509_v35 }
 0x131   : > { %v1030_v41 = vpop.f32.mrf.mxu0  ;;  %v1054_v42 = vpop.f32.mrf.mxu1  ;;  %v533_v13 = vadd.f32 %v525_v58, %v419_v57 }
 0x132   : > { %v1524_v5 = vadd.f32 %v1030_v41, %v1507_v36  ;;  %v538_v14 = vadd.f32 %v530_v60, %v424_v59  ;;  %v422_v15 = vmax.f32 %v404_v61, 0.0  ;;  %v521_v18 = vadd.f32 %v1054_v42, %v1507_v36 }
 0x133   : > { %v406_v53 = vpop.f32.mrf.mxu0  ;;  %v512_v54 = vpop.f32.mrf.mxu1  ;;  %v528_v22 = vmax.f32 %v510_v4, 0.0 }
 0x134   : > { %v425_v23 = vmax.f32 %v1524_v5, 0.0  ;;  %v407_v32 = vadd.f32 %v1507_v36, %v406_v53  ;;  %v513_v33 = vadd.f32 %v1507_v36, %v512_v54  ;;  %v531_v44 = vmax.f32 %v521_v18, 0.0 }
 0x135   : > { %v536_v43 = vadd.f32 %v528_v22, %v422_v15 }
 0x136   : > { %v423_v53 = vmax.f32 %v407_v32, 0.0  ;;  %v529_v54 = vmax.f32 %v513_v33, 0.0 }
 0x145   : > { %v1073_v62 = vpop.f32.mrf.mxu0  ;;  %v1097_v63 = vpop.f32.mrf.mxu1 }
 0x146   : > { %v616_v0 = vadd.f32 %v1073_v62, %v1507_v36  ;;  %v730_v1 = vadd.f32 %v1097_v63, %v1507_v36  ;;  %v539_v63 = vadd.f32 %v531_v44, %v425_v23 }
 0x147   : > { %v607_v6 = vpop.f32.mrf.mxu0  ;;  %v721_v7 = vpop.f32.mrf.mxu1 }
 0x148   : > { %v640_v8 = vmax.f32 %v616_v0, 0.0  ;;  %v754_v9 = vmax.f32 %v730_v1, 0.0  ;;  %v608_v10 = vadd.f32 %v1507_v36, %v607_v6  ;;  %v722_v11 = vadd.f32 %v1507_v36, %v721_v7 }
 0x149   : > { %v1074_v16 = vpop.f32.mrf.mxu0  ;;  %v1098_v17 = vpop.f32.mrf.mxu1 }
 0x14a   : > { %v648_v19 = vadd.f32 %v640_v8, %v534_v2  ;;  %v638_v20 = vmax.f32 %v608_v10, 0.0  ;;  %v619_v21 = vadd.f32 %v1074_v16, %v1507_v36  ;;  %v752_v24 = vmax.f32 %v722_v11, 0.0 }
 0x14b   : > { %v733_v25 = vadd.f32 %v1098_v17, %v1507_v36  ;;  %v610_v26 = vpop.f32.mrf.mxu0  ;;  %v724_v27 = vpop.f32.mrf.mxu1  ;;  %v537_v8 = vadd.f32 %v529_v54, %v423_v53 }
 0x14c   : > { %v762_v28 = vadd.f32 %v754_v9, %v648_v19  ;;  %v646_v29 = vadd.f32 %v638_v20, %v532_v3  ;;  %v641_v30 = vmax.f32 %v619_v21, 0.0  ;;  %v611_v31 = vadd.f32 %v1507_v36, %v610_v26 }
 0x14d   : > { %v755_v34 = vmax.f32 %v733_v25, 0.0  ;;  %v725_v35 = vadd.f32 %v1507_v36, %v724_v27  ;;  %v1077_v37 = vpop.f32.mrf.mxu0  ;;  %v1101_v38 = vpop.f32.mrf.mxu1 }
 0x14e   : > { %770 = vst [vmem:[%s1537_s29 + $0x10] sm:$0xff] %v762_v28  ;;  %v760_v39 = vadd.f32 %v752_v24, %v646_v29  ;;  %v649_v40 = vadd.f32 %v641_v30, %v535_v12  ;;  %v639_v41 = vmax.f32 %v611_v31, 0.0  ;;  %v632_v42 = vadd.f32 %v1077_v37, %v1507_v36 }
 0x14f   : > { %v753_v45 = vmax.f32 %v725_v35, 0.0  ;;  %v746_v46 = vadd.f32 %v1101_v38, %v1507_v36  ;;  %v623_v47 = vpop.f32.mrf.mxu0  ;;  %v737_v48 = vpop.f32.mrf.mxu1 }
 0x150   : > { %768 = vst [vmem:[%s1537_s29] sm:$0xff] %v760_v39  ;;  %v763_v49 = vadd.f32 %v755_v34, %v649_v40  ;;  %v647_v50 = vadd.f32 %v639_v41, %v533_v13  ;;  %v644_v51 = vmax.f32 %v632_v42, 0.0  ;;  %v624_v52 = vadd.f32 %v1507_v36, %v623_v47 }
 0x151   : > { %v758_v55 = vmax.f32 %v746_v46, 0.0  ;;  %v738_v56 = vadd.f32 %v1507_v36, %v737_v48  ;;  %v1078_v57 = vpop.f32.mrf.mxu0  ;;  %v1102_v58 = vpop.f32.mrf.mxu1 }
 0x152   : > { %771 = vst [vmem:[%s1537_s29 + $0x18] sm:$0xff] %v763_v49  ;;  %v761_v59 = vadd.f32 %v753_v45, %v647_v50  ;;  %v652_v60 = vadd.f32 %v644_v51, %v538_v14  ;;  %v642_v61 = vmax.f32 %v624_v52, 0.0  ;;  %v635_v62 = vadd.f32 %v1078_v57, %v1507_v36 }
 0x153   : > { %v756_v0 = vmax.f32 %v738_v56, 0.0  ;;  %v749_v1 = vadd.f32 %v1102_v58, %v1507_v36  ;;  %v626_v2 = vpop.f32.mrf.mxu0  ;;  %v740_v3 = vpop.f32.mrf.mxu1 }
 0x154   : > { %769 = vst [vmem:[%s1537_s29 + $0x8] sm:$0xff] %v761_v59  ;;  %v766_v4 = vadd.f32 %v758_v55, %v652_v60  ;;  %v650_v5 = vadd.f32 %v642_v61, %v536_v43  ;;  %v645_v6 = vmax.f32 %v635_v62, 0.0  ;;  %v627_v7 = vadd.f32 %v1507_v36, %v626_v2 }
 0x155   : > { %v741_v9 = vadd.f32 %v1507_v36, %v740_v3  ;;  %v759_v12 = vmax.f32 %v749_v1, 0.0 }
 0x156   : > { %774 = vst [vmem:[%s1537_s29 + $0x30] sm:$0xff] %v766_v4  ;;  %v764_v10 = vadd.f32 %v756_v0, %v650_v5  ;;  %v653_v11 = vadd.f32 %v645_v6, %v539_v63  ;;  %v643_v13 = vmax.f32 %v627_v7, 0.0 }
 0x157   : > { %v757_v16 = vmax.f32 %v741_v9, 0.0 }
 0x158   : > { %772 = vst [vmem:[%s1537_s29 + $0x20] sm:$0xff] %v764_v10  ;;  %v767_v14 = vadd.f32 %v759_v12, %v653_v11  ;;  %v651_v15 = vadd.f32 %v643_v13, %v537_v8 }
 0x15a   : > { %775 = vst [vmem:[%s1537_s29 + $0x38] sm:$0xff] %v767_v14  ;;  %v765_v36 = vadd.f32 %v757_v16, %v651_v15 }
 0x15c   : > { %773 = vst [vmem:[%s1537_s29 + $0x28] sm:$0xff] %v765_v36 }
 0x15d   : > { %1251 = shalt.err (!%p1248_p6)
}
 0x15e   : > { %s1252_s30 = scalar_lea.hbm %s1560_s9, 1024  ;;  %s1256_s7 = scalar_lea.hbm %s1613_s3, 2048 }
 0x15f   : > { %p1253_p3 = scmp.ne.s32.totalorder %s1560_s9, %s1252_s30  ;;  %p1257_p12 = scmp.lt.s32.totalorder %s1560_s9, %s1613_s3 }
 0x160   : > { %p1258_p8 = scmp.lt.s32.totalorder %s1256_s7, %s1252_s30 }
 0x161   : > { %p1254_p7 = pnand %p1253_p3, %p1625_p5 }
 0x162   : > { %p1259_p4 = por %p1258_p8, %p1257_p12 }
 0x163   : > { %p1255_p10 = pneg %p1254_p7 }
 0x165   : > { %p1260_p9 = pnand %p1259_p4, %p1255_p10 }
 0x167   : > { %1263 = shalt.err (!%p1260_p9)
}
 0x168   : > { %s1334_s25 = smov 128   ;;  %s1335_s29 = smov 8  }
 0x169   : > { %1116 = dma.vmem_to_hbm [thread:$0]  (%p1625_p5), %s1554_s10, 1024, %s1560_s9, %s777_s11, %s1334_s25, %s1334_s25, %s1335_s29  }
 0x16a PF: > { %s807_s24 = sand.u32 1, %s1302_s12   ;;  %p1626_p11 = scmp.ne.s32.totalorder %s1621_s28, 0 }
 0x16b   : > { %s808_s5 = scalar_lea.sflag [#allocation4], %s807_s24 }
 0x16c   : > { %p1123_p0 = pnand %p893_p13, %p1626_p11 }
 0x16e   : > { %p1124_p1 = pneg %p1123_p0 }
 0x170   : > { %1297 = dma.done.wait (%p1124_p1), %s808_s5, 1024  }
 0x171   : > { %1299 = vsyncadd (%p1124_p1), %s808_s5, 4294966272  ;;  %s20_s17 = sadd.s32 1, %s1322_s17   ;;  %s1627_s12 = smov %s1306_s13 }
 0x172   : > { %p17_p2 = scmp.ge.s32.totalorder %s20_s17, 4   ;;  %s1628_s13 = smov %s1310_s14 }
 0x173   : > { %s1629_s14 = smov %s1418_s27  ;;  %s1630_s15 = smov %s1318_s16 }
 0x174   : > { %s1631_s16 = smov %s1633_s20  ;;  %19 = sbr.rel (!%p17_p2) target bundleno = 9 (0x9), region = 89 }
 0x179   :  { %813 = vsyncpa [#allocation3], 1 }
 0x17a   :  { %815 = vsyncpa [#allocation3 + $0x1], 1 }
 0x17b   :  { %816 = vsyncpa [#allocation6], 1 }
 0x17c   :  { %817 = vsyncpa [#allocation4], 1 }
 0x17d   :  { %819 = vsyncpa [#allocation4 + $0x1], 1 }

</bundles_post_ra>
